<compile_context>
chip_gen: v5e
topology: v5e:2x2
jax: 0.10.0
libtpu: 0.0.40
codegen_flags: <defaults>
</compile_context>

<pallas_src>
import functools

import jax
import jax.numpy as jnp
from jax import lax
from jax.experimental import pallas as pl
from jax.experimental.pallas import tpu as pltpu


def _mlp_kernel(num_hidden, apply_mask, batch, bm, folded, x_ref, *refs):
    """One batch tile of the MLP forward.

    x_ref : (bm, d0)  -- batch on sublanes, features on lanes (native layout)
    refs  : parameter refs followed by the output ref.
        folded (identity activation): w_eff (1, d0), b_eff (1, 1)
        otherwise: W_1 (d1,d0), b_1 (d1,1), ..., W_{L-1} (d,d), b_{L-1} (d,1),
                   w_last (d, 1), b_last (1, 1)
    out   : (1, bm)   -- lane-dense output tile
    """
    out_ref = refs[-1]
    prefs = refs[:-1]

    x = x_ref[...].astype(jnp.float32)                        # (bm, d0)
    if apply_mask:
        # Zero the rows of the ragged last tile that lie past `batch`.
        row = lax.broadcasted_iota(jnp.int32, x.shape, 0) + pl.program_id(0) * bm
        x = jnp.where(row < batch, x, 0.0)

    if folded:
        # Whole network collapsed to a single affine map: one streaming pass.
        w = prefs[0][...]                                      # (1, d0)
        b = prefs[1][...]                                      # (1, 1)
        y = lax.dot_general(w, x, (((1,), (1,)), ((), ())),
                            preferred_element_type=jnp.float32) + b
    else:
        # First hidden layer: contract the feature axis of BOTH operands so
        # the batch tile stays on the lane axis of the result (no transpose
        # materialized in HBM; Mosaic handles the small in-VMEM reorder).
        w1 = prefs[0][...]                                     # (d1, d0)
        b1 = prefs[1][...]                                     # (d1, 1)
        h = lax.dot_general(w1, x, (((1,), (1,)), ((), ())),
                            preferred_element_type=jnp.float32) + b1
        h = jnp.tanh(h)                                        # EUP slot

        # Remaining hidden layers on the MXU, batch on lanes.
        for l in range(1, num_hidden):
            w = prefs[2 * l][...]                              # (d_out, d_in)
            b = prefs[2 * l + 1][...]                          # (d_out, 1)
            h = jnp.dot(w, h, preferred_element_type=jnp.float32) + b
            h = jnp.tanh(h)

        # Final Linear(width, 1): keep it off the MXU — VPU broadcast-multiply
        # by the weight column + sublane (feature-axis) reduction on the XLU.
        w_last = prefs[2 * num_hidden][...]                    # (d, 1)
        b_last = prefs[2 * num_hidden + 1][...]                # (1, 1)
        y = jnp.sum(w_last * h, axis=0, keepdims=True) + b_last  # (1, bm)

    out_ref[...] = y.astype(out_ref.dtype)                     # lane-dense store


def _tensorcores_per_chip():
    """2 on v7x (megacore sharding of the parallel axis), else 1."""
    try:
        kind = jax.devices()[0].device_kind.lower()
        if "v7" in kind:
            return 2
    except Exception:
        pass
    return 1


def mlp_forward(x, params, *, use_identity_activation=False, block_batch=8192):
    """x: (batch, num_inputs); params: PyTorch-layout [W1, b1, ..., WL, bL]."""
    num_layers = len(params) // 2
    batch, num_inputs = x.shape
    itemsize = jnp.dtype(x.dtype).itemsize

    # --- batch tiling (lane axis of the compute) ------------------------------
    ncores = _tensorcores_per_chip()
    batch128 = pl.cdiv(batch, 128) * 128
    # On v7x keep >= 2 grid steps so the "parallel" axis shards across both TCs;
    # on v5e/v6e (single TC) this reduces to the full rounded batch.
    per_core = pl.cdiv(pl.cdiv(batch128, ncores), 128) * 128
    bm = max(128, min(block_batch, per_core))
    padded_batch = pl.cdiv(batch, bm) * bm
    grid = (padded_batch // bm,)
    apply_mask = padded_batch != batch

    # --- kernel-layout parameters ---------------------------------------------
    if use_identity_activation:
        # A stack of Linears with no nonlinearity is itself a Linear: fold it.
        w_eff = params[0].astype(jnp.float32)                  # (d1, d0)
        b_eff = params[1].astype(jnp.float32)                  # (d1,)
        for l in range(1, num_layers):
            wl = params[2 * l].astype(jnp.float32)
            bl = params[2 * l + 1].astype(jnp.float32)
            b_eff = wl @ b_eff + bl
            w_eff = wl @ w_eff
        kparams = [w_eff.reshape(1, num_inputs), b_eff.reshape(1, 1)]
        num_hidden = 0
        folded = True
    else:
        kparams = []
        for l in range(num_layers):
            w = params[2 * l]
            b = params[2 * l + 1]
            if l == num_layers - 1:
                kparams.append(w.T.reshape(-1, 1))             # (d, 1) column
                kparams.append(b.reshape(1, 1))                # (1, 1)
            else:
                kparams.append(w)                              # (d_out, d_in)
                kparams.append(b.reshape(-1, 1))               # (d_out, 1)
        num_hidden = num_layers - 1
        folded = False

    kernel = functools.partial(_mlp_kernel, num_hidden, apply_mask, batch, bm,
                               folded)

    # x tiled over the batch; weights/biases full-array blocks with constant
    # index maps so they stay resident in VMEM across grid steps.
    in_specs = [pl.BlockSpec((bm, num_inputs), lambda i: (i, 0))]
    in_specs += [pl.BlockSpec(p.shape, lambda i: (0, 0)) for p in kparams]
    out_spec = pl.BlockSpec((1, bm), lambda i: (0, i))

    # --- advisory cost estimate -----------------------------------------------
    if use_identity_activation:
        flops = 2 * batch * num_inputs + batch
        transcendentals = 0
    else:
        flops = 0
        transcendentals = 0
        for l in range(num_layers):
            d_out, d_in = params[2 * l].shape
            flops += 2 * batch * d_in * d_out + batch * d_out
            if l != num_layers - 1:
                transcendentals += batch * d_out
    param_bytes = sum(int(p.size) * jnp.dtype(p.dtype).itemsize for p in kparams)
    bytes_accessed = int(x.size * itemsize + batch * itemsize + param_bytes)

    # Only raise the scoped-VMEM limit when the tile estimate actually needs it
    # (protects huge bm / num_inputs sweeps on v5e's 16 MiB scoped default).
    vmem_needed = 2 * (bm * num_inputs + bm) * itemsize + 2 * param_bytes + (2 << 20)
    vmem_limit = (int(min(max(vmem_needed, 16 << 20), 64 << 20))
                  if vmem_needed > (12 << 20) else None)

    out_t = pl.pallas_call(
        kernel,
        grid=grid,
        in_specs=in_specs,
        out_specs=out_spec,
        out_shape=jax.ShapeDtypeStruct((1, padded_batch), x.dtype),
        compiler_params=pltpu.CompilerParams(
            dimension_semantics=("parallel",),
            vmem_limit_bytes=vmem_limit,
        ),
        cost_estimate=pl.CostEstimate(
            flops=int(flops),
            transcendentals=int(transcendentals),
            bytes_accessed=int(bytes_accessed),
        ),
    )(x, *kparams)

    # (1, padded_batch) -> (batch, 1)
    return out_t[0, :batch][:, None]


def init_params(key, num_inputs, width_hidden_layer, num_layers=2):
    """PyTorch nn.Linear-style init and layout: W (out, in), b (out,)."""
    dims = [num_inputs] + [width_hidden_layer] * (num_layers - 1) + [1]
    params = []
    for i in range(num_layers):
        fan_in, fan_out = dims[i], dims[i + 1]
        key, k_w, k_b = jax.random.split(key, 3)
        bound = 1.0 / float(fan_in) ** 0.5
        w = jax.random.uniform(k_w, (fan_out, fan_in), jnp.float32, -bound, bound)
        b = jax.random.uniform(k_b, (fan_out,), jnp.float32, -bound, bound)
        params += [w, b]
    return params


def mlp_reference(x, params, *, use_identity_activation=False):
    """Pure-JAX reference of the PyTorch forward pass (standard layout)."""
    num_layers = len(params) // 2
    h = x.astype(jnp.float32)
    for layer in range(num_layers):
        w = params[2 * layer]
        b = params[2 * layer + 1]
        h = jnp.dot(h, w.T) + b
        if (not use_identity_activation) and layer != num_layers - 1:
            h = jnp.tanh(h)
    return h.astype(x.dtype)


if __name__ == "__main__":
    # Small shapes consistent with the module's forward: x (batch, num_inputs).
    batch = 8
    num_inputs = 16
    width_hidden_layer = 32
    num_layers = 3  # Linear -> Tanh -> Linear -> Tanh -> Linear(width, 1)

    key = jax.random.PRNGKey(0)
    key, k_x = jax.random.split(key)
    x = jax.random.normal(k_x, (batch, num_inputs), jnp.float32)

    params = init_params(key, num_inputs, width_hidden_layer, num_layers)

    # Default-precision MXU matmuls (bf16 passes) per the perf review, so use a
    # tolerance that comfortably covers the bf16 operand rounding while still
    # catching any layout / layer-ordering bug.
    tol = dict(atol=1e-2, rtol=1e-2)

    # Tanh variant
    out = mlp_forward(x, params, use_identity_activation=False)
    out = jax.block_until_ready(out)
    ref = mlp_reference(x, params, use_identity_activation=False)
    assert out.shape == (batch, 1), out.shape
    assert jnp.allclose(out, ref, **tol), (out, ref)

    # Identity-activation variant (whole stack folded to one affine map)
    out_id = mlp_forward(x, params, use_identity_activation=True)
    out_id = jax.block_until_ready(out_id)
    ref_id = mlp_reference(x, params, use_identity_activation=True)
    assert out_id.shape == (batch, 1), out_id.shape
    assert jnp.allclose(out_id, ref_id, **tol), (out_id, ref_id)

    print("KERNEL_OK")
</pallas_src>

<mosaic_0001>
module attributes {stable_mosaic.version = 11 : i64} {
  func.func @_mlp_kernel(%arg0: i32, %arg1: memref<128x16xf32, #tpu.memory_space<vmem>>, %arg2: memref<32x16xf32, #tpu.memory_space<vmem>>, %arg3: memref<32x1xf32, #tpu.memory_space<vmem>>, %arg4: memref<32x32xf32, #tpu.memory_space<vmem>>, %arg5: memref<32x1xf32, #tpu.memory_space<vmem>>, %arg6: memref<32x1xf32, #tpu.memory_space<vmem>>, %arg7: memref<1x1xf32, #tpu.memory_space<vmem>>, %arg8: memref<1x128xf32, #tpu.memory_space<vmem>>) attributes {dimension_semantics = [#tpu.dimension_semantics<parallel>], iteration_bounds = array<i64: 1>, scalar_prefetch = 0 : i64, scratch_operands = 0 : i64, tpu.core_type = #tpu.core_type<tc>, window_params = [{transform_indices = @transform_0, window_bounds = array<i64: 128, 16>}, {pipeline_mode = #tpu.pipeline_mode<synchronous>, transform_indices = @transform_1, window_bounds = array<i64: 32, 16>}, {pipeline_mode = #tpu.pipeline_mode<synchronous>, transform_indices = @transform_2, window_bounds = array<i64: 32, 1>}, {pipeline_mode = #tpu.pipeline_mode<synchronous>, transform_indices = @transform_3, window_bounds = array<i64: 32, 32>}, {pipeline_mode = #tpu.pipeline_mode<synchronous>, transform_indices = @transform_4, window_bounds = array<i64: 32, 1>}, {pipeline_mode = #tpu.pipeline_mode<synchronous>, transform_indices = @transform_5, window_bounds = array<i64: 32, 1>}, {pipeline_mode = #tpu.pipeline_mode<synchronous>, transform_indices = @transform_6, window_bounds = array<i64: 1, 1>}, {transform_indices = @transform_7, window_bounds = array<i64: 1, 128>}]} {
    %c0 = arith.constant 0 : index
    %c0_0 = arith.constant 0 : index
    %0 = vector.load %arg1[%c0, %c0_0] : memref<128x16xf32, #tpu.memory_space<vmem>>, vector<128x16xf32>
    %1 = tpu.iota {dimensions = array<i32: 0>} : vector<128x16xi32>
    %c128_i32 = arith.constant 128 : i32
    %2 = arith.muli %arg0, %c128_i32 : i32
    %3 = vector.broadcast %2 : i32 to vector<128x16xi32>
    %4 = arith.addi %1, %3 : vector<128x16xi32>
    %c8_i32 = arith.constant 8 : i32
    %5 = vector.broadcast %c8_i32 : i32 to vector<128x16xi32>
    %6 = arith.cmpi slt, %4, %5 : vector<128x16xi32>
    %cst = arith.constant 0.000000e+00 : f32
    %7 = vector.broadcast %cst : f32 to vector<128x16xf32>
    %8 = arith.select %6, %0, %7 : vector<128x16xi1>, vector<128x16xf32>
    %c0_1 = arith.constant 0 : index
    %c0_2 = arith.constant 0 : index
    %9 = vector.load %arg2[%c0_1, %c0_2] : memref<32x16xf32, #tpu.memory_space<vmem>>, vector<32x16xf32>
    %c0_3 = arith.constant 0 : index
    %c0_4 = arith.constant 0 : index
    %10 = vector.load %arg3[%c0_3, %c0_4] : memref<32x1xf32, #tpu.memory_space<vmem>>, vector<32x1xf32>
    %cst_5 = arith.constant dense<0.000000e+00> : vector<32x128xf32>
    %11 = tpu.matmul %9, %8, %cst_5 {dimension_numbers = #tpu.dot_dimension_numbers<[1], [1], [0], [0], [0, 0, 1, 0], [], []>} : vector<32x16xf32>, vector<128x16xf32>, vector<32x128xf32> -> vector<32x128xf32>
    %12 = vector.broadcast %10 : vector<32x1xf32> to vector<32x128xf32>
    %13 = arith.addf %11, %12 : vector<32x128xf32>
    %14 = math.tanh %13 : vector<32x128xf32>
    %c0_6 = arith.constant 0 : index
    %c0_7 = arith.constant 0 : index
    %15 = vector.load %arg4[%c0_6, %c0_7] : memref<32x32xf32, #tpu.memory_space<vmem>>, vector<32x32xf32>
    %c0_8 = arith.constant 0 : index
    %c0_9 = arith.constant 0 : index
    %16 = vector.load %arg5[%c0_8, %c0_9] : memref<32x1xf32, #tpu.memory_space<vmem>>, vector<32x1xf32>
    %cst_10 = arith.constant dense<0.000000e+00> : vector<32x128xf32>
    %17 = tpu.matmul %15, %14, %cst_10 {dimension_numbers = #tpu.dot_dimension_numbers<[1], [0], [0], [1], [0, 0, 1, 1], [], []>} : vector<32x32xf32>, vector<32x128xf32>, vector<32x128xf32> -> vector<32x128xf32>
    %18 = vector.broadcast %16 : vector<32x1xf32> to vector<32x128xf32>
    %19 = arith.addf %17, %18 : vector<32x128xf32>
    %20 = math.tanh %19 : vector<32x128xf32>
    %c0_11 = arith.constant 0 : index
    %c0_12 = arith.constant 0 : index
    %21 = vector.load %arg6[%c0_11, %c0_12] : memref<32x1xf32, #tpu.memory_space<vmem>>, vector<32x1xf32>
    %c0_13 = arith.constant 0 : index
    %c0_14 = arith.constant 0 : index
    %22 = vector.load %arg7[%c0_13, %c0_14] : memref<1x1xf32, #tpu.memory_space<vmem>>, vector<1x1xf32>
    %23 = vector.broadcast %21 : vector<32x1xf32> to vector<32x128xf32>
    %24 = arith.mulf %23, %20 : vector<32x128xf32>
    %cst_15 = arith.constant dense<0.000000e+00> : vector<128xf32>
    %25 = vector.multi_reduction <add>, %24, %cst_15 [0] : vector<32x128xf32> to vector<128xf32>
    %26 = vector.shape_cast %25 : vector<128xf32> to vector<1x128xf32>
    %27 = vector.broadcast %22 : vector<1x1xf32> to vector<1x128xf32>
    %28 = arith.addf %26, %27 : vector<1x128xf32>
    %c0_16 = arith.constant 0 : index
    %c0_17 = arith.constant 0 : index
    %29 = vector.load %arg8[%c0_16, %c0_17] : memref<1x128xf32, #tpu.memory_space<vmem>>, vector<1x128xf32>
    tpu.vector_store %arg8[%c0_16, %c0_17], %28 {strides = array<i32>} : memref<1x128xf32, #tpu.memory_space<vmem>>, vector<1x128xf32>,
    return
  }
  func.func @transform_0(%arg0: i32) -> (i32, i32) {
    %c0_i32 = arith.constant 0 : i32
    %c0_i32_0 = arith.constant 0 : i32
    return %arg0, %c0_i32 : i32, i32
  }
  func.func @transform_1(%arg0: i32) -> (i32, i32) {
    %c0_i32 = arith.constant 0 : i32
    %c0_i32_0 = arith.constant 0 : i32
    %c0_i32_1 = arith.constant 0 : i32
    return %c0_i32, %c0_i32_0 : i32, i32
  }
  func.func @transform_2(%arg0: i32) -> (i32, i32) {
    %c0_i32 = arith.constant 0 : i32
    %c0_i32_0 = arith.constant 0 : i32
    %c0_i32_1 = arith.constant 0 : i32
    return %c0_i32, %c0_i32_0 : i32, i32
  }
  func.func @transform_3(%arg0: i32) -> (i32, i32) {
    %c0_i32 = arith.constant 0 : i32
    %c0_i32_0 = arith.constant 0 : i32
    %c0_i32_1 = arith.constant 0 : i32
    return %c0_i32, %c0_i32_0 : i32, i32
  }
  func.func @transform_4(%arg0: i32) -> (i32, i32) {
    %c0_i32 = arith.constant 0 : i32
    %c0_i32_0 = arith.constant 0 : i32
    %c0_i32_1 = arith.constant 0 : i32
    return %c0_i32, %c0_i32_0 : i32, i32
  }
  func.func @transform_5(%arg0: i32) -> (i32, i32) {
    %c0_i32 = arith.constant 0 : i32
    %c0_i32_0 = arith.constant 0 : i32
    %c0_i32_1 = arith.constant 0 : i32
    return %c0_i32, %c0_i32_0 : i32, i32
  }
  func.func @transform_6(%arg0: i32) -> (i32, i32) {
    %c0_i32 = arith.constant 0 : i32
    %c0_i32_0 = arith.constant 0 : i32
    %c0_i32_1 = arith.constant 0 : i32
    return %c0_i32, %c0_i32_0 : i32, i32
  }
  func.func @transform_7(%arg0: i32) -> (i32, i32) {
    %c0_i32 = arith.constant 0 : i32
    %c0_i32_0 = arith.constant 0 : i32
    return %c0_i32, %arg0 : i32, i32
  }
}

</mosaic_0001>

<bundles_post_ra>
// kernel: tpu_custom_call.1
= control target key start
LH: loop header
LB: loop body
LE: loop exit
PB: predicated region body
PF: predicated region fallthrough
CT: control target
= control target key end

     0   :  { %s548_s0 = inlined_call_operand.vmem [shape: f32[8,16], index: 0, kind: input, shape index: {}]   ;;  %s549_s1 = inlined_call_operand.vmem [shape: f32[32,16], index: 1, kind: input, shape index: {}]   ;;  %s550_s2 = inlined_call_operand.vmem [shape: f32[32,1], index: 2, kind: input, shape index: {}]   ;;  %s551_s3 = inlined_call_operand.vmem [shape: f32[32,32], index: 3, kind: input, shape index: {}]   ;;  %s552_s4 = inlined_call_operand.vmem [shape: f32[32,1], index: 4, kind: input, shape index: {}]   ;;  %s553_s5 = inlined_call_operand.vmem [shape: f32[32,1], index: 5, kind: input, shape index: {}]   ;;  %s554_s6 = inlined_call_operand.<no memory space> [shape: f32[1,1], index: 6, kind: input, shape index: {}]   ;;  %s555_s7 = inlined_call_operand.hbm [shape: f32[1,128], index: 7, kind: output, shape index: {}]  }
   0x1   :  { %v12_v0 = vstv %s554_s6 }
   0x2   :  { %13 = vst [vmem:[#allocation2] sm:$0x1] %v12_v0 }
   0x3   :  { %v29_v1 = vld [vmem:[%s548_s0] sm:$0xff]  ;;  %vm140_vm0 = vcmask 130048   ;;  %v119_v2 = vld [vmem:[%s550_s2 + $0x18] sm:$0xff]  ;;  %v431_v3 = vmov 0   ;;  %v113_v4 = vld [vmem:[%s549_s1 + $0x8] sm:$0xff] }
   0x4   :  { %386 = vset.pattern.permute.xlu0 %v431_v3  ;;  %379 = vmatpush.xpose.msk.msra.mxu3 %vm140_vm0, %v29_v1  ;;  %v117_v5 = vld [vmem:[%s550_s2 + $0x8] sm:$0xff]  ;;  %v112_v6 = vld [vmem:[%s549_s1] sm:$0xff] }
   0x5   :  { %137 = vperm.xlu0 %386, %v119_v2   ;;  %387 = vset.pattern.permute.xlu1 %v431_v3 }
   0x6   :  { %127 = vperm.xlu1 %387, %v117_v5   ;;  %370 = vmatpush.xpose.msk.msra.mxu0 %vm140_vm0, %v29_v1 }
   0x7   :  { %372 = vmatmul.msk.f32.vlgmr.msra.gmra.mxu3 %vm140_vm0, %v113_v4  ;;  %388 = vset.pattern.permute.xlu2 %v431_v3 }
   0x8   :  { %14 = vsyncpa [#allocation4], 0  ;;  %v118_v7 = vld [vmem:[%s550_s2 + $0x10] sm:$0xff]  ;;  %v116_v8 = vld [vmem:[%s550_s2] sm:$0xff]  ;;  %vm262_vm1 = vcmask 261120   ;;  %s361_s17 = sshll.u32 %s555_s7, 4  ;;  %s362_s17 = int_to_ptr.hbm [resolvable:$true] %s361_s17 }
   0x9   :  { %371 = vmatmul.msk.f32.vlgmr.msra.gmra.mxu0 %vm140_vm0, %v112_v6  ;;  %v114_v9 = vld [vmem:[%s549_s1 + $0x10] sm:$0xff]  ;;  %v241_v11 = vld [vmem:[%s552_s4 + $0x18] sm:$0xff]  ;;  %v309_v13 = vld [vmem:[%s553_s5 + $0x8] sm:$0xff] }
   0xa   :  { %v240_v10 = vld [vmem:[%s552_s4 + $0x10] sm:$0xff]  ;;  %v115_v12 = vld [vmem:[%s549_s1 + $0x18] sm:$0xff]  ;;  %v312_v15 = vld [vmem:[#allocation2] sm:$0x1] }
   0xb   :  { %v310_v14 = vld [vmem:[%s553_s5 + $0x10] sm:$0xff]  ;;  %v238_v19 = vld [vmem:[%s552_s4] sm:$0xff]  ;;  %v239_v21 = vld [vmem:[%s552_s4 + $0x8] sm:$0xff] }
   0xc   :  { %244 = vperm.xlu2 %388, %v238_v19   ;;  %v308_v30 = vld [vmem:[%s553_s5] sm:$0xff]  ;;  %v236_v35 = vld [vmem:[%s551_s3 + $0x10] sm:$0xff]  ;;  %v311_v37 = vld [vmem:[%s553_s5 + $0x18] sm:$0xff] }
   0xd   :  { %132 = vperm.xlu0 %386, %v118_v7   ;;  %v234_v34 = vld [vmem:[%s551_s3] sm:$0xff]  ;;  %v235_v38 = vld [vmem:[%s551_s3 + $0x8] sm:$0xff]  ;;  %v237_v39 = vld [vmem:[%s551_s3 + $0x18] sm:$0xff]  ;;  %s432_s3 = smov [#allocation3]  }
   0xe   :  { %122 = vperm.xlu1 %387, %v116_v8   ;;  %s359_s5 = sshll.u32 %s432_s3, 4  ;;  %s360_s5 = int_to_ptr.vmem [resolvable:$true] %s359_s5 }
   0xf   :  { %373 = vmatmul.msk.f32.gmra.mxu3 %vm140_vm0, %v114_v9 }
  0x14   :  { %249 = vperm.xlu2 %388, %v239_v21  }
  0x15   :  { %254 = vperm.xlu0 %386, %v240_v10  }
  0x16   :  { %259 = vperm.xlu1 %387, %v241_v11  }
  0x17   :  { %374 = vmatmul.msk.f32.gmra.mxu3 %vm140_vm0, %v115_v12 }
  0x1c   :  { %315 = vperm.xlu2 %388, %v308_v30  }
  0x1d   :  { %320 = vperm.xlu0 %386, %v309_v13  }
  0x1e   :  { %325 = vperm.xlu1 %387, %v310_v14  }
  0x24   :  { %330 = vperm.xlu2 %388, %v311_v37  }
  0x25   :  { %348 = vperm.xlu0 %386, %v312_v15  }
  0x66   :  { %v245_v40 = vpop.permute.xlu2 %244 }
  0x6e   :  { %v250_v42 = vpop.permute.xlu2 %249 }
  0x76   :  { %v316_v50 = vpop.permute.xlu2 %315 }
  0x77   :  { %v138_v17 = vpop.permute.xlu0 %137 }
  0x78   :  { %v128_v20 = vpop.permute.xlu1 %127 }
  0x7e   :  { %v331_v63 = vpop.permute.xlu2 %330 }
  0x7f   :  { %v133_v22 = vpop.permute.xlu0 %132 }
  0x80   :  { %v123_v28 = vpop.permute.xlu1 %122 }
  0x86   :  { %v218_v26 = vpop.f32.mrf.mxu0 }
  0x87   :  { %v219_v29 = vadd.f32 %v218_v26, %v123_v28  ;;  %v255_v45 = vpop.permute.xlu0 %254 }
  0x88   :  { %v260_v49 = vpop.permute.xlu1 %259 }
  0x8a   :  { %v221_v16 = vpop.f32.mrf.mxu3 }
  0x8b   :  { %v222_v27 = vadd.f32 %v221_v16, %v128_v20 }
  0x8f   :  { %v321_v55 = vpop.permute.xlu0 %320 }
  0x90   :  { %v326_v60 = vpop.permute.xlu1 %325 }
  0x92   :  { %v224_v18 = vpop.f32.mrf.mxu3 }
  0x93   :  { %v225_v24 = vadd.f32 %v224_v18, %v133_v22 }
  0x97   :  { %v349_v7 = vpop.permute.xlu0 %348 }
  0x98   :  { %v351_v9 = vperm.slane %v349_v7, 0 }
  0x9a   :  { %v227_v23 = vpop.f32.mrf.mxu3 }
  0x9b   :  { %v228_v25 = vadd.f32 %v227_v23, %v138_v17 }
  0x9d   :  { %389 = vtanh.f32 %v228_v25 }
  0x9e   :  { %391 = vtanh.f32 %v225_v24 }
  0x9f   :  { %393 = vtanh.f32 %v222_v27 }
  0xa0   :  { %395 = vtanh.f32 %v219_v29 }
  0xa3   :  { %v390_v31 = vpop.eup %389 }
  0xa4   :  { %287 = vmatpush.msra.mxu1 %v390_v31  ;;  %380 = vmatpush.msra.mxu2 %v390_v31  ;;  %v392_v32 = vpop.eup %391 }
  0xa5   :  { %v394_v33 = vpop.eup %393 }
  0xa6   :  { %288 = vmatpush.msra.mxu1 %v392_v32  ;;  %381 = vmatpush.msra.mxu2 %v392_v32  ;;  %v396_v36 = vpop.eup %395 }
  0xa8   :  { %289 = vmatpush.msra.mxu1 %v394_v33  ;;  %382 = vmatpush.msra.mxu2 %v394_v33 }
  0xaa   :  { %290 = vmatpush.msra.mxu1 %v396_v36  ;;  %383 = vmatpush.msra.mxu2 %v396_v36 }
  0xab   :  { %375 = vmatmul.msk.f32.vlgmr.msra.gmra.mxu1 %vm262_vm1, %v234_v34  ;;  %377 = vmatmul.msk.f32.vlgmr.msra.gmra.mxu2 %vm262_vm1, %v236_v35 }
  0xb3   :  { %376 = vmatmul.msk.f32.gmra.mxu1 %vm262_vm1, %v235_v38  ;;  %378 = vmatmul.msk.f32.gmra.mxu2 %vm262_vm1, %v237_v39 }
 0x128   :  { %v292_v41 = vpop.f32.mrf.mxu1 }
 0x129   :  { %v293_v43 = vadd.f32 %v292_v41, %v245_v40 }
 0x12b   :  { %397 = vtanh.f32 %v293_v43 }
 0x12e   :  { %v298_v44 = vpop.f32.mrf.mxu2 }
 0x12f   :  { %v299_v47 = vadd.f32 %v298_v44, %v255_v45 }
 0x130   :  { %v295_v46 = vpop.f32.mrf.mxu1 }
 0x131   :  { %v296_v48 = vadd.f32 %v295_v46, %v250_v42  ;;  %v398_v52 = vpop.eup %397 }
 0x132   :  { %v333_v56 = vmul.f32 %v398_v52, %v316_v50 }
 0x133   :  { %399 = vtanh.f32 %v296_v48 }
 0x134   :  { %401 = vtanh.f32 %v299_v47 }
 0x136   :  { %v301_v51 = vpop.f32.mrf.mxu2 }
 0x137   :  { %v302_v53 = vadd.f32 %v301_v51, %v260_v49 }
 0x139   :  { %v400_v54 = vpop.eup %399  ;;  %403 = vtanh.f32 %v302_v53 }
 0x13a   :  { %v334_v57 = vmul.f32 %v400_v54, %v321_v55  ;;  %v402_v58 = vpop.eup %401 }
 0x13b   :  { %v335_v61 = vmul.f32 %v402_v58, %v326_v60 }
 0x13c   :  { %v337_v59 = vadd.f32 %v334_v57, %v333_v56 }
 0x13e   :  { %v338_v1 = vadd.f32 %v337_v59, %v335_v61 }
 0x13f   :  { %v404_v62 = vpop.eup %403 }
 0x140   :  { %v336_v0 = vmul.f32 %v404_v62, %v331_v63 }
 0x142   :  { %v339_v2 = vadd.f32 %v338_v1, %v336_v0 }
 0x144   :  { %v340_v3 = vrot.slane %v339_v2, 4 }
 0x146   :  { %v341_v4 = vadd.f32 %v340_v3, %v339_v2 }
 0x148   :  { %v342_v5 = vrot.slane %v341_v4, 2 }
 0x14a   :  { %v343_v6 = vadd.f32 %v342_v5, %v341_v4 }
 0x14c   :  { %v344_v8 = vrot.slane %v343_v6, 1 }
 0x14e   :  { %v345_v10 = vadd.f32 %v344_v8, %v343_v6 }
 0x150   :  { %v352_v11 = vadd.f32 %v351_v9, %v345_v10 }
 0x152   :  { %353 = vst [vmem:[#allocation3] sm:$0x1] %v352_v11 }
 0x153   :  { %364 = dma.vmem_to_hbm [thread:$0]  %s360_s5, 16, %s362_s17, [#allocation4]  }
 0x154   :  { %429 = dma.done.wait [#allocation4], 16  }
 0x155   :  { %430 = vsyncadd [#allocation4], 4294967280 }
 0x156   :  { %369 = vsyncpa [#allocation4], 1 }

</bundles_post_ra>
